<compile_context>
chip_gen: v7x
topology: tpu7x:2x2x1
jax: 0.10.0
libtpu: 0.0.40
codegen_flags: <defaults>
</compile_context>

<pallas_src>
import jax
import jax.numpy as jnp
from jax.experimental import pallas as pl
from jax.experimental.pallas import tpu as pltpu


def _round_up(x, m):
    return ((x + m - 1) // m) * m


def _cdiv(a, b):
    return -(-a // b)


def _hardswish(x):
    # PyTorch Hardswish: x * relu6(x + 3) / 6
    return x * jnp.clip(x + 3.0, 0.0, 6.0) * (1.0 / 6.0)


def critic_adv_kernel(x_ref,
                      w1_ref, b1_ref,
                      w2_ref, b2_ref,
                      w3_ref, b3_ref,
                      w4_ref, b4_ref,
                      o_ref):
    x = x_ref[...]                                   # (tb, sd) bf16 batch tile

    # Layer 1: Linear + ReLU (bf16 MXU operands, f32 accumulate / elementwise).
    h1 = jnp.dot(x, w1_ref[...], preferred_element_type=jnp.float32) + b1_ref[...]
    h1 = jnp.maximum(h1, 0.0)

    # Layer 2: Linear + ReLU.
    h2 = jnp.dot(h1.astype(jnp.bfloat16), w2_ref[...],
                 preferred_element_type=jnp.float32) + b2_ref[...]
    h2 = jnp.maximum(h2, 0.0)

    # Layer 3: Linear + Hardswish.
    h3 = jnp.dot(h2.astype(jnp.bfloat16), w3_ref[...],
                 preferred_element_type=jnp.float32) + b3_ref[...]
    h3 = _hardswish(h3)

    # Head (mid -> 1): contract the hidden dim of w4 (1, mid_p) against h3
    # (tb, mid_p) so the result lands lane-dense as a (1, tb) row -> unmasked
    # vector stores + contiguous writeback DMA instead of (tb, 1) masked stores.
    q_row = jax.lax.dot_general(
        w4_ref[...], h3.astype(jnp.bfloat16),
        dimension_numbers=(((1,), (1,)), ((), ())),
        preferred_element_type=jnp.float32)          # (1, tb)
    o_ref[0] = q_row + b4_ref[0, 0]                  # scalar bias from SMEM


def critic_forward(state, params, *, block_batch=1024):
    """Pallas forward pass of CriticAdv: returns (B, 1) f32 Q-values."""
    B, sd = state.shape
    (w1, b1), (w2, b2), (w3, b3), (w4, b4) = params
    mid = w1.shape[1]
    mid_p = _round_up(mid, 128)          # lane-pad hidden dim (bit-exact, see header)

    # ---- operand preparation (cheap, one-time per call, tiny vs. state stream) ----
    def _pad2(a, rows, cols):
        return jnp.pad(a, ((0, rows - a.shape[0]), (0, cols - a.shape[1])))

    w1p = _pad2(w1, sd, mid_p).astype(jnp.bfloat16)
    w2p = _pad2(w2, mid_p, mid_p).astype(jnp.bfloat16)
    w3p = _pad2(w3, mid_p, mid_p).astype(jnp.bfloat16)
    w4p = _pad2(jnp.reshape(w4, (1, mid)), 1, mid_p).astype(jnp.bfloat16)
    b1p = _pad2(b1, 1, mid_p).astype(jnp.float32)
    b2p = _pad2(b2, 1, mid_p).astype(jnp.float32)
    b3p = _pad2(b3, 1, mid_p).astype(jnp.float32)
    b4s = jnp.reshape(b4, (1, 1)).astype(jnp.float32)

    # ---- batch tiling: 16-sublane granularity (bf16), >=2 grid steps if possible ----
    g = 16
    tb = min(block_batch, _round_up(B, g))
    if B > g:                                # leave work for the 2nd TensorCore (v7x)
        tb = min(tb, _round_up(_cdiv(B, 2), g))
    tb = max(tb, g)
    num_tiles = _cdiv(B, tb)
    pad_b = num_tiles * tb

    x_bf = state.astype(jnp.bfloat16)
    if pad_b != B:                           # whole tiles only: no undefined rows
        x_bf = jnp.pad(x_bf, ((0, pad_b - B), (0, 0)))

    # ---- cost / VMEM budget ----
    flops = 2 * B * (sd * mid_p + 2 * mid_p * mid_p + mid_p)
    weight_bytes = (sd * mid_p + 2 * mid_p * mid_p + mid_p) * 2 + 3 * mid_p * 4 + 4
    bytes_accessed = pad_b * sd * 2 + pad_b * 4 + weight_bytes
    cost = pl.CostEstimate(flops=int(flops), transcendentals=0,
                           bytes_accessed=int(bytes_accessed))

    stream_vmem = 2 * tb * sd * 2 + 2 * tb * 4       # double-buffered state/out tiles
    act_vmem = 4 * tb * mid_p * 4                    # h1..h3 temporaries + slack
    # Generous for v5e/v6e (128 MiB physical), but capped at 48 MiB so the same
    # config never overruns v7x's 64 MiB per-TensorCore VMEM.
    vmem_limit = int(min(max(2 * (weight_bytes + stream_vmem + act_vmem),
                             32 * 1024 * 1024),
                         48 * 1024 * 1024))

    def _specs(weight_mode):
        def _resident(shape):
            # Whole-array VMEM operand, constant index map -> resident across steps.
            if weight_mode is None:
                return pl.BlockSpec(shape, lambda i: (0, 0))
            return pl.BlockSpec(shape, lambda i: (0, 0), pipeline_mode=weight_mode)

        in_specs = [
            pl.BlockSpec((tb, sd), lambda i: (i, 0)),           # state tile (pipelined)
            _resident((sd, mid_p)), _resident((1, mid_p)),      # w1, b1
            _resident((mid_p, mid_p)), _resident((1, mid_p)),   # w2, b2
            _resident((mid_p, mid_p)), _resident((1, mid_p)),   # w3, b3
            _resident((1, mid_p)),                              # w4 (as row)
            pl.BlockSpec(memory_space=pltpu.MemorySpace.SMEM),  # b4 scalar
        ]
        out_specs = pl.BlockSpec((1, 1, tb), lambda i: (i, 0, 0))
        return in_specs, out_specs

    def _call(weight_mode):
        in_specs, out_specs = _specs(weight_mode)
        return pl.pallas_call(
            critic_adv_kernel,
            out_shape=jax.ShapeDtypeStruct((num_tiles, 1, tb), jnp.float32),
            grid=(num_tiles,),
            in_specs=in_specs,
            out_specs=out_specs,
            compiler_params=pltpu.CompilerParams(
                dimension_semantics=("parallel",),    # shard batch tiles across TCs
                vmem_limit_bytes=vmem_limit),
            cost_estimate=cost,
        )(x_bf, w1p, b1p, w2p, b2p, w3p, b3p, w4p, b4s)

    try:
        # Weights/biases are DMA'd once: single-buffer them to save resident VMEM.
        out = _call(pl.Buffered(1))
    except Exception:  # pragma: no cover - fallback if pipeline_mode unsupported
        out = _call(None)

    return out.reshape(-1)[:B].reshape(B, 1)


def init_critic_params(key, mid_dim, state_dim):
    """Deterministic init mimicking torch.nn.Linear (uniform +-1/sqrt(fan_in)).
    Weights stored as (in_features, out_features)."""
    dims = [(state_dim, mid_dim),
            (mid_dim, mid_dim),
            (mid_dim, mid_dim),
            (mid_dim, 1)]
    params = []
    for (fan_in, fan_out) in dims:
        key, kw, kb = jax.random.split(key, 3)
        bound = 1.0 / jnp.sqrt(jnp.float32(fan_in))
        w = jax.random.uniform(kw, (fan_in, fan_out), jnp.float32, -bound, bound)
        b = jax.random.uniform(kb, (1, fan_out), jnp.float32, -bound, bound)
        params.append((w, b))
    return params


def critic_reference(state, params, matmul_dtype=jnp.float32):
    """Pure-JAX reference. matmul_dtype=bf16 emulates the kernel's MXU numerics."""
    (w1, b1), (w2, b2), (w3, b3), (w4, b4) = params

    def dot(a, w):
        return jnp.dot(a.astype(matmul_dtype), w.astype(matmul_dtype),
                       preferred_element_type=jnp.float32)

    x = state.astype(jnp.float32)
    h = jnp.maximum(dot(x, w1) + b1, 0.0)
    h = jnp.maximum(dot(h, w2) + b2, 0.0)
    h = dot(h, w3) + b3
    h = h * jnp.clip(h + 3.0, 0.0, 6.0) * (1.0 / 6.0)
    return dot(h, w4) + b4


if __name__ == "__main__":
    mid_dim, state_dim, action_dim = 32, 16, 8      # action_dim unused by CriticAdv

    key = jax.random.PRNGKey(0)
    k_params, k_data = jax.random.split(key, 2)
    params = init_critic_params(k_params, mid_dim, state_dim)

    # Aligned batch and a ragged batch (exercises batch padding + 2 grid steps).
    for batch in (8, 40):
        k_data, k_state = jax.random.split(k_data)
        state = jax.random.normal(k_state, (batch, state_dim), jnp.float32)

        q = jax.block_until_ready(critic_forward(state, params))
        assert q.shape == (batch, 1)

        # Tight check against a reference that emulates the kernel's bf16 matmuls.
        q_bf = critic_reference(state, params, matmul_dtype=jnp.bfloat16)
        assert jnp.allclose(q, q_bf, atol=1e-4, rtol=1e-3), \
            float(jnp.max(jnp.abs(q - q_bf)))

        # Loose sanity check against the full-f32 PyTorch-equivalent module.
        q_f32 = critic_reference(state, params, matmul_dtype=jnp.float32)
        assert jnp.allclose(q, q_f32, atol=1e-1, rtol=1e-1), \
            float(jnp.max(jnp.abs(q - q_f32)))

    print("KERNEL_OK")
</pallas_src>

<mosaic_0001>
module attributes {stable_mosaic.version = 11 : i64} {
  func.func @critic_adv_kernel(%arg0: i32, %arg1: memref<16x16xbf16, #tpu.memory_space<vmem>>, %arg2: memref<16x128xbf16, #tpu.memory_space<vmem>>, %arg3: memref<1x128xf32, #tpu.memory_space<vmem>>, %arg4: memref<128x128xbf16, #tpu.memory_space<vmem>>, %arg5: memref<1x128xf32, #tpu.memory_space<vmem>>, %arg6: memref<128x128xbf16, #tpu.memory_space<vmem>>, %arg7: memref<1x128xf32, #tpu.memory_space<vmem>>, %arg8: memref<1x128xbf16, #tpu.memory_space<vmem>>, %arg9: memref<1x1xf32, #tpu.memory_space<smem>>, %arg10: memref<1x1x16xf32, #tpu.memory_space<vmem>>) attributes {dimension_semantics = [#tpu.dimension_semantics<parallel>], iteration_bounds = array<i64: 1>, scalar_prefetch = 0 : i64, scratch_operands = 0 : i64, tpu.core_type = #tpu.core_type<tc>, window_params = [{transform_indices = @transform_0, window_bounds = array<i64: 16, 16>}, {pipeline_mode = #tpu.pipeline_mode<synchronous>, transform_indices = @transform_1, window_bounds = array<i64: 16, 128>}, {pipeline_mode = #tpu.pipeline_mode<synchronous>, transform_indices = @transform_2, window_bounds = array<i64: 1, 128>}, {pipeline_mode = #tpu.pipeline_mode<synchronous>, transform_indices = @transform_3, window_bounds = array<i64: 128, 128>}, {pipeline_mode = #tpu.pipeline_mode<synchronous>, transform_indices = @transform_4, window_bounds = array<i64: 1, 128>}, {pipeline_mode = #tpu.pipeline_mode<synchronous>, transform_indices = @transform_5, window_bounds = array<i64: 128, 128>}, {pipeline_mode = #tpu.pipeline_mode<synchronous>, transform_indices = @transform_6, window_bounds = array<i64: 1, 128>}, {pipeline_mode = #tpu.pipeline_mode<synchronous>, transform_indices = @transform_7, window_bounds = array<i64: 1, 128>}, {transform_indices = @transform_8, window_bounds = array<i64: 1, 1>}, {transform_indices = @transform_9, window_bounds = array<i64: 1, 1, 16>}]} {
    %c0 = arith.constant 0 : index
    %c0_0 = arith.constant 0 : index
    %0 = vector.load %arg1[%c0, %c0_0] : memref<16x16xbf16, #tpu.memory_space<vmem>>, vector<16x16xbf16>
    %c0_1 = arith.constant 0 : index
    %c0_2 = arith.constant 0 : index
    %1 = vector.load %arg2[%c0_1, %c0_2] : memref<16x128xbf16, #tpu.memory_space<vmem>>, vector<16x128xbf16>
    %cst = arith.constant dense<0.000000e+00> : vector<16x128xf32>
    %2 = tpu.matmul %0, %1, %cst {dimension_numbers = #tpu.dot_dimension_numbers<[1], [0], [0], [1], [0, 0, 1, 1], [], []>} : vector<16x16xbf16>, vector<16x128xbf16>, vector<16x128xf32> -> vector<16x128xf32>
    %c0_3 = arith.constant 0 : index
    %c0_4 = arith.constant 0 : index
    %3 = vector.load %arg3[%c0_3, %c0_4] : memref<1x128xf32, #tpu.memory_space<vmem>>, vector<1x128xf32>
    %4 = vector.broadcast %3 : vector<1x128xf32> to vector<16x128xf32>
    %5 = arith.addf %2, %4 : vector<16x128xf32>
    %cst_5 = arith.constant 0.000000e+00 : f32
    %6 = vector.broadcast %cst_5 : f32 to vector<16x128xf32>
    %7 = arith.maximumf %5, %6 : vector<16x128xf32>
    %8 = arith.truncf %7 : vector<16x128xf32> to vector<16x128xbf16>
    %c0_6 = arith.constant 0 : index
    %c0_7 = arith.constant 0 : index
    %9 = vector.load %arg4[%c0_6, %c0_7] : memref<128x128xbf16, #tpu.memory_space<vmem>>, vector<128x128xbf16>
    %cst_8 = arith.constant dense<0.000000e+00> : vector<16x128xf32>
    %10 = tpu.matmul %8, %9, %cst_8 {dimension_numbers = #tpu.dot_dimension_numbers<[1], [0], [0], [1], [0, 0, 1, 1], [], []>} : vector<16x128xbf16>, vector<128x128xbf16>, vector<16x128xf32> -> vector<16x128xf32>
    %c0_9 = arith.constant 0 : index
    %c0_10 = arith.constant 0 : index
    %11 = vector.load %arg5[%c0_9, %c0_10] : memref<1x128xf32, #tpu.memory_space<vmem>>, vector<1x128xf32>
    %12 = vector.broadcast %11 : vector<1x128xf32> to vector<16x128xf32>
    %13 = arith.addf %10, %12 : vector<16x128xf32>
    %cst_11 = arith.constant 0.000000e+00 : f32
    %14 = vector.broadcast %cst_11 : f32 to vector<16x128xf32>
    %15 = arith.maximumf %13, %14 : vector<16x128xf32>
    %16 = arith.truncf %15 : vector<16x128xf32> to vector<16x128xbf16>
    %c0_12 = arith.constant 0 : index
    %c0_13 = arith.constant 0 : index
    %17 = vector.load %arg6[%c0_12, %c0_13] : memref<128x128xbf16, #tpu.memory_space<vmem>>, vector<128x128xbf16>
    %cst_14 = arith.constant dense<0.000000e+00> : vector<16x128xf32>
    %18 = tpu.matmul %16, %17, %cst_14 {dimension_numbers = #tpu.dot_dimension_numbers<[1], [0], [0], [1], [0, 0, 1, 1], [], []>} : vector<16x128xbf16>, vector<128x128xbf16>, vector<16x128xf32> -> vector<16x128xf32>
    %c0_15 = arith.constant 0 : index
    %c0_16 = arith.constant 0 : index
    %19 = vector.load %arg7[%c0_15, %c0_16] : memref<1x128xf32, #tpu.memory_space<vmem>>, vector<1x128xf32>
    %20 = vector.broadcast %19 : vector<1x128xf32> to vector<16x128xf32>
    %21 = arith.addf %18, %20 : vector<16x128xf32>
    %cst_17 = arith.constant 3.000000e+00 : f32
    %22 = vector.broadcast %cst_17 : f32 to vector<16x128xf32>
    %23 = arith.addf %21, %22 : vector<16x128xf32>
    %cst_18 = arith.constant 0.000000e+00 : f32
    %cst_19 = arith.constant 6.000000e+00 : f32
    %24 = vector.broadcast %cst_18 : f32 to vector<16x128xf32>
    %25 = arith.maximumf %24, %23 : vector<16x128xf32>
    %26 = vector.broadcast %cst_19 : f32 to vector<16x128xf32>
    %27 = arith.minimumf %26, %25 : vector<16x128xf32>
    %28 = arith.mulf %21, %27 : vector<16x128xf32>
    %cst_20 = arith.constant 0.166666672 : f32
    %29 = vector.broadcast %cst_20 : f32 to vector<16x128xf32>
    %30 = arith.mulf %28, %29 : vector<16x128xf32>
    %c0_21 = arith.constant 0 : index
    %c0_22 = arith.constant 0 : index
    %31 = vector.load %arg8[%c0_21, %c0_22] : memref<1x128xbf16, #tpu.memory_space<vmem>>, vector<1x128xbf16>
    %32 = arith.truncf %30 : vector<16x128xf32> to vector<16x128xbf16>
    %cst_23 = arith.constant dense<0.000000e+00> : vector<1x16xf32>
    %33 = tpu.matmul %31, %32, %cst_23 {dimension_numbers = #tpu.dot_dimension_numbers<[1], [1], [0], [0], [0, 0, 1, 0], [], []>} : vector<1x128xbf16>, vector<16x128xbf16>, vector<1x16xf32> -> vector<1x16xf32>
    %c0_24 = arith.constant 0 : index
    %c0_25 = arith.constant 0 : index
    %34 = memref.load %arg9[%c0_24, %c0_25] : memref<1x1xf32, #tpu.memory_space<smem>>
    %35 = vector.broadcast %34 : f32 to vector<1x16xf32>
    %36 = arith.addf %33, %35 : vector<1x16xf32>
    %c0_26 = arith.constant 0 : index
    %c0_27 = arith.constant 0 : index
    %c0_28 = arith.constant 0 : index
    %37 = vector.load %arg10[%c0_26, %c0_27, %c0_28] : memref<1x1x16xf32, #tpu.memory_space<vmem>>, vector<1x1x16xf32>
    %38 = vector.shape_cast %37 : vector<1x1x16xf32> to vector<1x16xf32>
    %39 = vector.shape_cast %36 : vector<1x16xf32> to vector<1x1x16xf32>
    tpu.vector_store %arg10[%c0_26, %c0_27, %c0_28], %39 {strides = array<i32>} : memref<1x1x16xf32, #tpu.memory_space<vmem>>, vector<1x1x16xf32>,
    return
  }
  func.func @transform_0(%arg0: i32) -> (i32, i32) {
    %c0_i32 = arith.constant 0 : i32
    %c0_i32_0 = arith.constant 0 : i32
    return %arg0, %c0_i32 : i32, i32
  }
  func.func @transform_1(%arg0: i32) -> (i32, i32) {
    %c0_i32 = arith.constant 0 : i32
    %c0_i32_0 = arith.constant 0 : i32
    %c0_i32_1 = arith.constant 0 : i32
    return %c0_i32, %c0_i32_0 : i32, i32
  }
  func.func @transform_2(%arg0: i32) -> (i32, i32) {
    %c0_i32 = arith.constant 0 : i32
    %c0_i32_0 = arith.constant 0 : i32
    %c0_i32_1 = arith.constant 0 : i32
    return %c0_i32, %c0_i32_0 : i32, i32
  }
  func.func @transform_3(%arg0: i32) -> (i32, i32) {
    %c0_i32 = arith.constant 0 : i32
    %c0_i32_0 = arith.constant 0 : i32
    %c0_i32_1 = arith.constant 0 : i32
    return %c0_i32, %c0_i32_0 : i32, i32
  }
  func.func @transform_4(%arg0: i32) -> (i32, i32) {
    %c0_i32 = arith.constant 0 : i32
    %c0_i32_0 = arith.constant 0 : i32
    %c0_i32_1 = arith.constant 0 : i32
    return %c0_i32, %c0_i32_0 : i32, i32
  }
  func.func @transform_5(%arg0: i32) -> (i32, i32) {
    %c0_i32 = arith.constant 0 : i32
    %c0_i32_0 = arith.constant 0 : i32
    %c0_i32_1 = arith.constant 0 : i32
    return %c0_i32, %c0_i32_0 : i32, i32
  }
  func.func @transform_6(%arg0: i32) -> (i32, i32) {
    %c0_i32 = arith.constant 0 : i32
    %c0_i32_0 = arith.constant 0 : i32
    %c0_i32_1 = arith.constant 0 : i32
    return %c0_i32, %c0_i32_0 : i32, i32
  }
  func.func @transform_7(%arg0: i32) -> (i32, i32) {
    %c0_i32 = arith.constant 0 : i32
    %c0_i32_0 = arith.constant 0 : i32
    %c0_i32_1 = arith.constant 0 : i32
    return %c0_i32, %c0_i32_0 : i32, i32
  }
  func.func @transform_8(%arg0: i32) -> (i32, i32) {
    %c0_i32 = arith.constant 0 : i32
    %c0_i32_0 = arith.constant 0 : i32
    %c0_i32_1 = arith.constant 0 : i32
    return %c0_i32, %c0_i32_0 : i32, i32
  }
  func.func @transform_9(%arg0: i32) -> (i32, i32, i32) {
    %c0_i32 = arith.constant 0 : i32
    %c0_i32_0 = arith.constant 0 : i32
    %c0_i32_1 = arith.constant 0 : i32
    return %arg0, %c0_i32, %c0_i32_0 : i32, i32, i32
  }
}

module attributes {stable_mosaic.version = 11 : i64} {
  func.func @critic_adv_kernel(%arg0: i32, %arg1: memref<16x16xbf16, #tpu.memory_space<vmem>>, %arg2: memref<16x128xbf16, #tpu.memory_space<vmem>>, %arg3: memref<1x128xf32, #tpu.memory_space<vmem>>, %arg4: memref<128x128xbf16, #tpu.memory_space<vmem>>, %arg5: memref<1x128xf32, #tpu.memory_space<vmem>>, %arg6: memref<128x128xbf16, #tpu.memory_space<vmem>>, %arg7: memref<1x128xf32, #tpu.memory_space<vmem>>, %arg8: memref<1x128xbf16, #tpu.memory_space<vmem>>, %arg9: memref<1x1xf32, #tpu.memory_space<smem>>, %arg10: memref<1x1x16xf32, #tpu.memory_space<vmem>>) attributes {dimension_semantics = [#tpu.dimension_semantics<parallel>], iteration_bounds = array<i64: 1>, scalar_prefetch = 0 : i64, scratch_operands = 0 : i64, tpu.core_type = #tpu.core_type<tc>, window_params = [{transform_indices = @transform_0, window_bounds = array<i64: 16, 16>}, {pipeline_mode = #tpu.pipeline_mode<synchronous>, transform_indices = @transform_1, window_bounds = array<i64: 16, 128>}, {pipeline_mode = #tpu.pipeline_mode<synchronous>, transform_indices = @transform_2, window_bounds = array<i64: 1, 128>}, {pipeline_mode = #tpu.pipeline_mode<synchronous>, transform_indices = @transform_3, window_bounds = array<i64: 128, 128>}, {pipeline_mode = #tpu.pipeline_mode<synchronous>, transform_indices = @transform_4, window_bounds = array<i64: 1, 128>}, {pipeline_mode = #tpu.pipeline_mode<synchronous>, transform_indices = @transform_5, window_bounds = array<i64: 128, 128>}, {pipeline_mode = #tpu.pipeline_mode<synchronous>, transform_indices = @transform_6, window_bounds = array<i64: 1, 128>}, {pipeline_mode = #tpu.pipeline_mode<synchronous>, transform_indices = @transform_7, window_bounds = array<i64: 1, 128>}, {transform_indices = @transform_8, window_bounds = array<i64: 1, 1>}, {transform_indices = @transform_9, window_bounds = array<i64: 1, 1, 16>}]} {
    %c0 = arith.constant 0 : index
    %c0_0 = arith.constant 0 : index
    %0 = vector.load %arg1[%c0, %c0_0] : memref<16x16xbf16, #tpu.memory_space<vmem>>, vector<16x16xbf16>
    %c0_1 = arith.constant 0 : index
    %c0_2 = arith.constant 0 : index
    %1 = vector.load %arg2[%c0_1, %c0_2] : memref<16x128xbf16, #tpu.memory_space<vmem>>, vector<16x128xbf16>
    %cst = arith.constant dense<0.000000e+00> : vector<16x128xf32>
    %2 = tpu.matmul %0, %1, %cst {dimension_numbers = #tpu.dot_dimension_numbers<[1], [0], [0], [1], [0, 0, 1, 1], [], []>} : vector<16x16xbf16>, vector<16x128xbf16>, vector<16x128xf32> -> vector<16x128xf32>
    %c0_3 = arith.constant 0 : index
    %c0_4 = arith.constant 0 : index
    %3 = vector.load %arg3[%c0_3, %c0_4] : memref<1x128xf32, #tpu.memory_space<vmem>>, vector<1x128xf32>
    %4 = vector.broadcast %3 : vector<1x128xf32> to vector<16x128xf32>
    %5 = arith.addf %2, %4 : vector<16x128xf32>
    %cst_5 = arith.constant 0.000000e+00 : f32
    %6 = vector.broadcast %cst_5 : f32 to vector<16x128xf32>
    %7 = arith.maximumf %5, %6 : vector<16x128xf32>
    %8 = arith.truncf %7 : vector<16x128xf32> to vector<16x128xbf16>
    %c0_6 = arith.constant 0 : index
    %c0_7 = arith.constant 0 : index
    %9 = vector.load %arg4[%c0_6, %c0_7] : memref<128x128xbf16, #tpu.memory_space<vmem>>, vector<128x128xbf16>
    %cst_8 = arith.constant dense<0.000000e+00> : vector<16x128xf32>
    %10 = tpu.matmul %8, %9, %cst_8 {dimension_numbers = #tpu.dot_dimension_numbers<[1], [0], [0], [1], [0, 0, 1, 1], [], []>} : vector<16x128xbf16>, vector<128x128xbf16>, vector<16x128xf32> -> vector<16x128xf32>
    %c0_9 = arith.constant 0 : index
    %c0_10 = arith.constant 0 : index
    %11 = vector.load %arg5[%c0_9, %c0_10] : memref<1x128xf32, #tpu.memory_space<vmem>>, vector<1x128xf32>
    %12 = vector.broadcast %11 : vector<1x128xf32> to vector<16x128xf32>
    %13 = arith.addf %10, %12 : vector<16x128xf32>
    %cst_11 = arith.constant 0.000000e+00 : f32
    %14 = vector.broadcast %cst_11 : f32 to vector<16x128xf32>
    %15 = arith.maximumf %13, %14 : vector<16x128xf32>
    %16 = arith.truncf %15 : vector<16x128xf32> to vector<16x128xbf16>
    %c0_12 = arith.constant 0 : index
    %c0_13 = arith.constant 0 : index
    %17 = vector.load %arg6[%c0_12, %c0_13] : memref<128x128xbf16, #tpu.memory_space<vmem>>, vector<128x128xbf16>
    %cst_14 = arith.constant dense<0.000000e+00> : vector<16x128xf32>
    %18 = tpu.matmul %16, %17, %cst_14 {dimension_numbers = #tpu.dot_dimension_numbers<[1], [0], [0], [1], [0, 0, 1, 1], [], []>} : vector<16x128xbf16>, vector<128x128xbf16>, vector<16x128xf32> -> vector<16x128xf32>
    %c0_15 = arith.constant 0 : index
    %c0_16 = arith.constant 0 : index
    %19 = vector.load %arg7[%c0_15, %c0_16] : memref<1x128xf32, #tpu.memory_space<vmem>>, vector<1x128xf32>
    %20 = vector.broadcast %19 : vector<1x128xf32> to vector<16x128xf32>
    %21 = arith.addf %18, %20 : vector<16x128xf32>
    %cst_17 = arith.constant 3.000000e+00 : f32
    %22 = vector.broadcast %cst_17 : f32 to vector<16x128xf32>
    %23 = arith.addf %21, %22 : vector<16x128xf32>
    %cst_18 = arith.constant 0.000000e+00 : f32
    %cst_19 = arith.constant 6.000000e+00 : f32
    %24 = vector.broadcast %cst_18 : f32 to vector<16x128xf32>
    %25 = arith.maximumf %24, %23 : vector<16x128xf32>
    %26 = vector.broadcast %cst_19 : f32 to vector<16x128xf32>
    %27 = arith.minimumf %26, %25 : vector<16x128xf32>
    %28 = arith.mulf %21, %27 : vector<16x128xf32>
    %cst_20 = arith.constant 0.166666672 : f32
    %29 = vector.broadcast %cst_20 : f32 to vector<16x128xf32>
    %30 = arith.mulf %28, %29 : vector<16x128xf32>
    %c0_21 = arith.constant 0 : index
    %c0_22 = arith.constant 0 : index
    %31 = vector.load %arg8[%c0_21, %c0_22] : memref<1x128xbf16, #tpu.memory_space<vmem>>, vector<1x128xbf16>
    %32 = arith.truncf %30 : vector<16x128xf32> to vector<16x128xbf16>
    %cst_23 = arith.constant dense<0.000000e+00> : vector<1x16xf32>
    %33 = tpu.matmul %31, %32, %cst_23 {dimension_numbers = #tpu.dot_dimension_numbers<[1], [1], [0], [0], [0, 0, 1, 0], [], []>} : vector<1x128xbf16>, vector<16x128xbf16>, vector<1x16xf32> -> vector<1x16xf32>
    %c0_24 = arith.constant 0 : index
    %c0_25 = arith.constant 0 : index
    %34 = memref.load %arg9[%c0_24, %c0_25] : memref<1x1xf32, #tpu.memory_space<smem>>
    %35 = vector.broadcast %34 : f32 to vector<1x16xf32>
    %36 = arith.addf %33, %35 : vector<1x16xf32>
    %c0_26 = arith.constant 0 : index
    %c0_27 = arith.constant 0 : index
    %c0_28 = arith.constant 0 : index
    %37 = vector.load %arg10[%c0_26, %c0_27, %c0_28] : memref<1x1x16xf32, #tpu.memory_space<vmem>>, vector<1x1x16xf32>
    %38 = vector.shape_cast %37 : vector<1x1x16xf32> to vector<1x16xf32>
    %39 = vector.shape_cast %36 : vector<1x16xf32> to vector<1x1x16xf32>
    tpu.vector_store %arg10[%c0_26, %c0_27, %c0_28], %39 {strides = array<i32>} : memref<1x1x16xf32, #tpu.memory_space<vmem>>, vector<1x1x16xf32>,
    return
  }
  func.func @transform_0(%arg0: i32) -> (i32, i32) {
    %c0_i32 = arith.constant 0 : i32
    %c0_i32_0 = arith.constant 0 : i32
    return %arg0, %c0_i32 : i32, i32
  }
  func.func @transform_1(%arg0: i32) -> (i32, i32) {
    %c0_i32 = arith.constant 0 : i32
    %c0_i32_0 = arith.constant 0 : i32
    %c0_i32_1 = arith.constant 0 : i32
    return %c0_i32, %c0_i32_0 : i32, i32
  }
  func.func @transform_2(%arg0: i32) -> (i32, i32) {
    %c0_i32 = arith.constant 0 : i32
    %c0_i32_0 = arith.constant 0 : i32
    %c0_i32_1 = arith.constant 0 : i32
    return %c0_i32, %c0_i32_0 : i32, i32
  }
  func.func @transform_3(%arg0: i32) -> (i32, i32) {
    %c0_i32 = arith.constant 0 : i32
    %c0_i32_0 = arith.constant 0 : i32
    %c0_i32_1 = arith.constant 0 : i32
    return %c0_i32, %c0_i32_0 : i32, i32
  }
  func.func @transform_4(%arg0: i32) -> (i32, i32) {
    %c0_i32 = arith.constant 0 : i32
    %c0_i32_0 = arith.constant 0 : i32
    %c0_i32_1 = arith.constant 0 : i32
    return %c0_i32, %c0_i32_0 : i32, i32
  }
  func.func @transform_5(%arg0: i32) -> (i32, i32) {
    %c0_i32 = arith.constant 0 : i32
    %c0_i32_0 = arith.constant 0 : i32
    %c0_i32_1 = arith.constant 0 : i32
    return %c0_i32, %c0_i32_0 : i32, i32
  }
  func.func @transform_6(%arg0: i32) -> (i32, i32) {
    %c0_i32 = arith.constant 0 : i32
    %c0_i32_0 = arith.constant 0 : i32
    %c0_i32_1 = arith.constant 0 : i32
    return %c0_i32, %c0_i32_0 : i32, i32
  }
  func.func @transform_7(%arg0: i32) -> (i32, i32) {
    %c0_i32 = arith.constant 0 : i32
    %c0_i32_0 = arith.constant 0 : i32
    %c0_i32_1 = arith.constant 0 : i32
    return %c0_i32, %c0_i32_0 : i32, i32
  }
  func.func @transform_8(%arg0: i32) -> (i32, i32) {
    %c0_i32 = arith.constant 0 : i32
    %c0_i32_0 = arith.constant 0 : i32
    %c0_i32_1 = arith.constant 0 : i32
    return %c0_i32, %c0_i32_0 : i32, i32
  }
  func.func @transform_9(%arg0: i32) -> (i32, i32, i32) {
    %c0_i32 = arith.constant 0 : i32
    %c0_i32_0 = arith.constant 0 : i32
    %c0_i32_1 = arith.constant 0 : i32
    return %arg0, %c0_i32, %c0_i32_0 : i32, i32, i32
  }
}

</mosaic_0001>

<bundles_post_ra>
// kernel: tpu_custom_call.1
= control target key start
LH: loop header
LB: loop body
LE: loop exit
PB: predicated region body
PF: predicated region fallthrough
CT: control target
= control target key end

     0   :  { %15 = vsyncpa [#allocation4], 0  ;;  %s887_s0 = inlined_call_operand.hbm [shape: bf16[16,16], index: 0, kind: input, shape index: {}]   ;;  %s888_s1 = inlined_call_operand.hbm [shape: bf16[16,128], index: 1, kind: input, shape index: {}]   ;;  %s889_s2 = inlined_call_operand.vmem [shape: f32[1,128], index: 2, kind: input, shape index: {}]   ;;  %s890_s3 = inlined_call_operand.hbm [shape: bf16[128,128], index: 3, kind: input, shape index: {}]   ;;  %s891_s4 = inlined_call_operand.vmem [shape: f32[1,128], index: 4, kind: input, shape index: {}]   ;;  %s892_s5 = inlined_call_operand.hbm [shape: bf16[128,128], index: 5, kind: input, shape index: {}]   ;;  %s893_s6 = inlined_call_operand.vmem [shape: f32[1,128], index: 6, kind: input, shape index: {}]   ;;  %s894_s7 = inlined_call_operand.vmem [shape: bf16[1,128], index: 7, kind: input, shape index: {}]   ;;  %s895_s8 = inlined_call_operand.<no memory space> [shape: f32[1,1], index: 8, kind: input, shape index: {}]   ;;  %s896_s9 = inlined_call_operand.hbm [shape: f32[1,1,16], index: 9, kind: output, shape index: {}]  }
   0x1   :  { %16 = vsyncpa [#allocation7], 0 }
   0x2   :  { %17 = vsyncpa [#allocation10], 0 }
   0x3   :  { %18 = vsyncpa [#allocation5], 0  ;;  %s701_s30 = smov [#allocation6]   ;;  %s702_s11 = smov [#allocation3]  }
   0x4   :  { %s36_s10 = sshll.u32 %s701_s30, 4  ;;  %s24_s12 = sshll.u32 %s702_s11, 4  ;;  %s37_s10 = int_to_ptr.vmem [resolvable:$true] %s36_s10  ;;  %s760_s12 = int_to_ptr.vmem [resolvable:$true] %s24_s12 }
   0x5   :  { %s583_s15 = scalar_lea.hbm %s888_s1, 128 }
   0x6   :  { %p584_p0 = scmp.ne.s32.totalorder %s888_s1, %s583_s15  ;;  %p587_p1 = scmp.lt.u32.totalorder %s583_s15, %s888_s1 }
   0x8   :  { %p589_p2 = pnand %p587_p1, %p584_p0 }
   0xa   :  { %592 = shalt.err (!%p589_p2)
}
   0xb   :  { %s593_s20 = scalar_lea.vmem %s37_s10, 128  ;;  %p598_p4 = scmp.lt.s32.totalorder %s37_s10, %s37_s10 }
   0xc   :  { %p594_p3 = scmp.ne.s32.totalorder %s37_s10, %s593_s20  ;;  %p599_p5 = scmp.lt.s32.totalorder %s593_s20, %s593_s20 }
   0xe   :  { %p600_p6 = por %p599_p5, %p598_p4 }
  0x10   :  { %p601_p7 = pnand %p600_p6, %p594_p3 }
  0x12   :  { %604 = shalt.err (!%p601_p7)
}
  0x13   :  { %s703_s21 = smov 64   ;;  %s704_s22 = smov 4  }
  0x14   :  { %42 = dma.hbm_to_vmem [thread:$0]  %s888_s1, 128, %s37_s10, [#allocation7], %s703_s21, %s703_s21, %s704_s22  }
  0x15   :  { %s605_s27 = scalar_lea.hbm %s887_s0, 128 }
  0x16   :  { %p606_p8 = scmp.ne.s32.totalorder %s887_s0, %s605_s27  ;;  %p609_p9 = scmp.lt.u32.totalorder %s605_s27, %s887_s0 }
  0x18   :  { %p611_p10 = pnand %p609_p9, %p606_p8 }
  0x1a   :  { %614 = shalt.err (!%p611_p10)
}
  0x1b   :  { %s615_s13 = scalar_lea.vmem %s760_s12, 128  ;;  %p620_p12 = scmp.lt.s32.totalorder %s760_s12, %s760_s12 }
  0x1c   :  { %p616_p11 = scmp.ne.s32.totalorder %s760_s12, %s615_s13  ;;  %p621_p13 = scmp.lt.s32.totalorder %s615_s13, %s615_s13 }
  0x1e   :  { %p622_p0 = por %p621_p13, %p620_p12 }
  0x20   :  { %p623_p1 = pnand %p622_p0, %p616_p11 }
  0x22   :  { %626 = shalt.err (!%p623_p1)
}
  0x23   :  { %30 = dma.hbm_to_vmem [thread:$0]  %s887_s0, 128, %s760_s12, [#allocation4], %s703_s21, %s703_s21, %s704_s22  }
  0x24   :  { %s705_s14 = smov [#allocation8]   ;;  %s706_s16 = smov [#allocation9]  }
  0x25   :  { %s50_s15 = sshll.u32 %s705_s14, 4  ;;  %s64_s17 = sshll.u32 %s706_s16, 4  ;;  %s51_s15 = int_to_ptr.vmem [resolvable:$true] %s50_s15  ;;  %s797_s17 = int_to_ptr.vmem [resolvable:$true] %s64_s17 }
  0x26   :  { %s627_s20 = scalar_lea.hbm %s890_s3, 1024 }
  0x27   :  { %p628_p2 = scmp.ne.s32.totalorder %s890_s3, %s627_s20  ;;  %p631_p3 = scmp.lt.u32.totalorder %s627_s20, %s890_s3 }
  0x29   :  { %p633_p4 = pnand %p631_p3, %p628_p2 }
  0x2b   :  { %636 = shalt.err (!%p633_p4)
}
  0x2c   :  { %s637_s0 = scalar_lea.vmem %s51_s15, 1024  ;;  %p642_p6 = scmp.lt.s32.totalorder %s51_s15, %s51_s15 }
  0x2d   :  { %p638_p5 = scmp.ne.s32.totalorder %s51_s15, %s637_s0  ;;  %p643_p7 = scmp.lt.s32.totalorder %s637_s0, %s637_s0 }
  0x2f   :  { %p644_p8 = por %p643_p7, %p642_p6 }
  0x31   :  { %p645_p9 = pnand %p644_p8, %p638_p5 }
  0x33   :  { %648 = shalt.err (!%p645_p9)
}
  0x34   :  { %56 = dma.hbm_to_vmem [thread:$0]  %s890_s3, 1024, %s51_s15, [#allocation7], %s703_s21, %s703_s21, %s704_s22  }
  0x35   :  { %s649_s30 = scalar_lea.hbm %s892_s5, 1024 }
  0x36   :  { %p650_p10 = scmp.ne.s32.totalorder %s892_s5, %s649_s30  ;;  %p653_p11 = scmp.lt.u32.totalorder %s649_s30, %s892_s5 }
  0x38   :  { %p655_p12 = pnand %p653_p11, %p650_p10 }
  0x3a   :  { %658 = shalt.err (!%p655_p12)
}
  0x3b   :  { %s659_s14 = scalar_lea.vmem %s797_s17, 1024  ;;  %p664_p0 = scmp.lt.s32.totalorder %s797_s17, %s797_s17 }
  0x3c   :  { %p660_p13 = scmp.ne.s32.totalorder %s797_s17, %s659_s14  ;;  %p665_p1 = scmp.lt.s32.totalorder %s659_s14, %s659_s14 }
  0x3e   :  { %p666_p2 = por %p665_p1, %p664_p0 }
  0x40   :  { %p667_p3 = pnand %p666_p2, %p660_p13 }
  0x42   :  { %670 = shalt.err (!%p667_p3)
}
  0x43   :  { %70 = dma.hbm_to_vmem [thread:$0]  %s892_s5, 1024, %s797_s17, [#allocation10], %s703_s21, %s703_s21, %s704_s22  }
  0x44   :  { %693 = dma.done.wait [#allocation4], 128  }
  0x45   :  { %694 = vsyncadd [#allocation4], 4294967168 }
  0x46   :  { %695 = dma.done.wait [#allocation7], 1152  }
  0x47   :  { %696 = vsyncadd [#allocation7], 4294966144 }
  0x48   :  { %697 = dma.done.wait [#allocation10], 1024  }
  0x49   :  { %698 = vsyncadd [#allocation10], 4294966272  ;;  %v707_v0 = vmov 0.0   ;;  %vm708_vm0 = vmmov 0   ;;  %v565_v1 = vld [vmem:[#allocation6] sm:$0xff]   ;;  %v566_v2 = vld [vmem:[#allocation3] sm:$0xff]   ;;  %v400_v58 = vstv %s895_s8 }
  0x4a   :  { %504 = vmatprep.subr.bf16.mxu0 %v707_v0  ;;  %506 = vmatprep.mubr.msk.bf16.mxu0 %vm708_vm0, %v707_v0  ;;  %vm112_vm1 = vcmask 130048   ;;  %v567_v3 = vld [vmem:[#allocation8] sm:$0xff]   ;;  %v568_v4 = vld [vmem:[#allocation8 + $0x8] sm:$0xff]   ;;  %v569_v5 = vld [vmem:[#allocation8 + $0x10] sm:$0xff]   ;;  %s709_s20 = smov [#allocation11]   ;;  %vm441_vm2 = vcmask 122880  }
  0x4b   :  { %510 = vmatprep.subr.bf16.mxu1 %v707_v0  ;;  %526 = vmatprep.mubr.msk.bf16.mxu1 %vm708_vm0, %v707_v0  ;;  %v570_v6 = vld [vmem:[#allocation8 + $0x18] sm:$0xff]   ;;  %v571_v7 = vld [vmem:[#allocation8 + $0x20] sm:$0xff]   ;;  %v572_v8 = vld [vmem:[#allocation8 + $0x28] sm:$0xff]   ;;  %s449_s23 = sshll.u32 %s709_s20, 4  ;;  %s450_s23 = int_to_ptr.vmem [resolvable:$true] %s449_s23 }
  0x4c   :  { %505 = vmatpush3.bf16.msra.mxu0 %v565_v1  ;;  %511 = vmatpush3.bf16.msra.mxu1 %v567_v3  ;;  %v573_v9 = vld [vmem:[#allocation8 + $0x30] sm:$0xff]   ;;  %v574_v10 = vld [vmem:[#allocation8 + $0x38] sm:$0xff]   ;;  %v575_v11 = vld [vmem:[#allocation9] sm:$0xff]   ;;  %s671_s24 = scalar_lea.vmem %s450_s23, 16  ;;  %s675_s25 = scalar_lea.vmem %s450_s23, 32 }
  0x4d   :  { %530 = vmatprep.subr.bf16.mxu0 %v707_v0  ;;  %512 = vmatprep.subr.bf16.mxu1 %v707_v0  ;;  %v576_v12 = vld [vmem:[#allocation9 + $0x8] sm:$0xff]   ;;  %v577_v13 = vld [vmem:[#allocation9 + $0x10] sm:$0xff]   ;;  %v578_v14 = vld [vmem:[#allocation9 + $0x18] sm:$0xff]   ;;  %p672_p4 = scmp.ne.s32.totalorder %s450_s23, %s671_s24  ;;  %p676_p5 = scmp.lt.s32.totalorder %s450_s23, %s450_s23 }
  0x4e   :  { %v579_v15 = vld [vmem:[#allocation9 + $0x20] sm:$0xff]   ;;  %v580_v16 = vld [vmem:[#allocation9 + $0x28] sm:$0xff]   ;;  %v460_v17 = vld [vmem:[%s889_s2] ss:$0 sm:$0xff]  ;;  %p677_p6 = scmp.lt.s32.totalorder %s675_s25, %s671_s24 }
  0x4f   :  { %507 = vmatmul.mubr.msk.bf16.vlgmr.msra.gmra.mrb[0].mxu0 %vm112_vm1, %v566_v2  ;;  %v581_v27 = vld [vmem:[#allocation9 + $0x30] sm:$0xff]   ;;  %v582_v28 = vld [vmem:[#allocation9 + $0x38] sm:$0xff]  }
  0x50   :  { %546 = vmatprep.mubr.msk.bf16.mxu0 %vm708_vm0, %v707_v0  ;;  %513 = vmatpush3.bf16.msra.mxu1 %v568_v4  ;;  %v464_v29 = vld [vmem:[%s891_s4] ss:$0 sm:$0xff]  ;;  %p678_p7 = por %p677_p6, %p676_p5 }
  0x51   :  { %514 = vmatprep.subr.bf16.mxu1 %v707_v0  ;;  %531 = vmatpush3.bf16.msra.mxu0 %v575_v11  ;;  %v473_v39 = vld [vmem:[%s893_s6] ss:$0 sm:$0xff] }
  0x52   :  { %532 = vmatprep.subr.bf16.mxu0 %v707_v0  ;;  %v397_v57 = vld [vmem:[%s894_s7] sm:$0x1]  ;;  %p679_p8 = pnand %p678_p7, %p672_p4 }
  0x54   :  { %515 = vmatpush3.bf16.msra.mxu1 %v569_v5 }
  0x55   :  { %516 = vmatprep.subr.bf16.mxu1 %v707_v0  ;;  %533 = vmatpush3.bf16.msra.mxu0 %v576_v12 }
  0x56   :  { %534 = vmatprep.subr.bf16.mxu0 %v707_v0 }
  0x58   :  { %517 = vmatpush3.bf16.msra.mxu1 %v570_v6 }
  0x59   :  { %518 = vmatprep.subr.bf16.mxu1 %v707_v0  ;;  %535 = vmatpush3.bf16.msra.mxu0 %v577_v13 }
  0x5a   :  { %536 = vmatprep.subr.bf16.mxu0 %v707_v0 }
  0x5c   :  { %519 = vmatpush3.bf16.msra.mxu1 %v571_v7 }
  0x5d   :  { %520 = vmatprep.subr.bf16.mxu1 %v707_v0  ;;  %537 = vmatpush3.bf16.msra.mxu0 %v578_v14 }
  0x5e   :  { %538 = vmatprep.subr.bf16.mxu0 %v707_v0 }
  0x60   :  { %521 = vmatpush3.bf16.msra.mxu1 %v572_v8 }
  0x61   :  { %522 = vmatprep.subr.bf16.mxu1 %v707_v0  ;;  %539 = vmatpush3.bf16.msra.mxu0 %v579_v15 }
  0x62   :  { %540 = vmatprep.subr.bf16.mxu0 %v707_v0 }
  0x64   :  { %523 = vmatpush3.bf16.msra.mxu1 %v573_v9 }
  0x65   :  { %524 = vmatprep.subr.bf16.mxu1 %v707_v0  ;;  %541 = vmatpush3.bf16.msra.mxu0 %v580_v16 }
  0x66   :  { %542 = vmatprep.subr.bf16.mxu0 %v707_v0 }
  0x68   :  { %525 = vmatpush3.bf16.msra.mxu1 %v574_v10 }
  0x69   :  { %550 = vmatprep.subr.bf16.mxu1 %v707_v0  ;;  %543 = vmatpush3.bf16.msra.mxu0 %v581_v27 }
  0x6a   :  { %544 = vmatprep.subr.bf16.mxu0 %v707_v0 }
  0x6d   :  { %545 = vmatpush3.bf16.msra.mxu0 %v582_v28 }
 0x122   :  { %v150_v18 = vpop.f32.mrb[0].mxu0 }
 0x123   :  { %v151_v19 = vadd.f32 %v460_v17, %v150_v18  ;;  %v508_v20 = vpop.f32.mrb[1].mxu0 }
 0x124   :  { %v153_v21 = vpop.f32.mrb[2].mxu0 }
 0x125   :  { %v154_v22 = vadd.f32 %v460_v17, %v153_v21  ;;  %v509_v23 = vpop.f32.mrb[3].mxu0  ;;  %v157_v24 = vmax.f32 %v151_v19, 0.0 }
 0x127   :  { %v158_v25 = vmax.f32 %v154_v22, 0.0 }
 0x129   :  { %v159_v26 = vpack.c.bf16 %v158_v25, %v157_v24 }
 0x12b   :  { %527 = vmatmul.mubr.bf16.vlgmr.msra.gmra.mrb[0].mxu1 %v159_v26 }
 0x12c   :  { %552 = vmatprep.mubr.msk.bf16.mxu1 %vm708_vm0, %v707_v0 }
 0x1fe   :  { %v265_v30 = vpop.f32.mrb[0].mxu1 }
 0x1ff   :  { %v266_v31 = vadd.f32 %v464_v29, %v265_v30  ;;  %v528_v32 = vpop.f32.mrb[1].mxu1 }
 0x200   :  { %v268_v33 = vpop.f32.mrb[2].mxu1 }
 0x201   :  { %v269_v34 = vadd.f32 %v464_v29, %v268_v33  ;;  %v529_v35 = vpop.f32.mrb[3].mxu1  ;;  %v272_v36 = vmax.f32 %v266_v31, 0.0 }
 0x203   :  { %v273_v37 = vmax.f32 %v269_v34, 0.0 }
 0x205   :  { %v274_v38 = vpack.c.bf16 %v273_v37, %v272_v36 }
 0x207   :  { %547 = vmatmul.mubr.bf16.vlgmr.msra.gmra.mrb[4].mxu0 %v274_v38 }
 0x2da   :  { %v380_v40 = vpop.f32.mrb[4].mxu0 }
 0x2db   :  { %v381_v41 = vadd.f32 %v473_v39, %v380_v40  ;;  %v548_v42 = vpop.f32.mrb[5].mxu0 }
 0x2dc   :  { %v383_v43 = vpop.f32.mrb[6].mxu0 }
 0x2dd   :  { %v387_v44 = vadd.f32 3.0, %v381_v41  ;;  %v384_v45 = vadd.f32 %v473_v39, %v383_v43  ;;  %v549_v46 = vpop.f32.mrb[7].mxu0 }
 0x2df   :  { %v389_v47 = vmax.f32 %v387_v44, 0.0  ;;  %v388_v48 = vadd.f32 3.0, %v384_v45 }
 0x2e1   :  { %v391_v49 = vmin.f32 %v389_v47, 6.0  ;;  %v390_v50 = vmax.f32 %v388_v48, 0.0 }
 0x2e3   :  { %v393_v51 = vmul.f32 %v391_v49, %v381_v41  ;;  %v392_v52 = vmin.f32 %v390_v50, 6.0 }
 0x2e5   :  { %v394_v53 = vmul.f32 %v392_v52, %v384_v45  ;;  %v395_v54 = vmul.f32 0.16666667, %v393_v51 }
 0x2e7   :  { %v396_v55 = vmul.f32 0.16666667, %v394_v53 }
 0x2e9   :  { %v398_v56 = vpack.c.bf16 %v396_v55, %v395_v54 }
 0x2eb   :  { %551 = vmatpush3.bf16.xpose.msra.mxu1 %v398_v56 }
 0x2f2   :  { %553 = vmatmul.mubr.bf16.vlgmr.msra.gmra.mrb[4].mxu1 %v397_v57 }
 0x3c5   :  { %v435_v59 = vpop.f32.mrb[4].mxu1 }
 0x3c6   :  { %v436_v60 = vadd.f32 %v435_v59, %v400_v58  ;;  %v554_v61 = vpop.f32.mrb[5].mxu1 }
 0x3c7   :  { %v438_v62 = vpop.f32.mrb[6].mxu1 }
 0x3c8   :  { %v555_v63 = vpop.f32.mrb[7].mxu1  ;;  %442 = vst.msk [vmem:[#allocation11] sm:$0x1] %vm441_vm2, %v436_v60 }
 0x3c9   :  { %682 = shalt.err (!%p679_p8)
}
 0x3ca   :  { %s683_s26 = scalar_lea.hbm %s896_s9, 16 }
 0x3cb   :  { %p684_p9 = scmp.ne.s32.totalorder %s896_s9, %s683_s26  ;;  %p687_p10 = scmp.lt.u32.totalorder %s683_s26, %s896_s9 }
 0x3cd   :  { %p689_p11 = pnand %p687_p10, %p684_p9 }
 0x3cf   :  { %692 = shalt.err (!%p689_p11)
}
 0x3d0   :  { %452 = dma.vmem_to_hbm [thread:$0]  %s450_s23, 16, %s896_s9, [#allocation5]  }
 0x3d1   :  { %699 = dma.done.wait [#allocation5], 16  }
 0x3d2   :  { %700 = vsyncadd [#allocation5], 4294967280 }
 0x3d3   :  { %456 = vsyncpa [#allocation4], 1 }
 0x3d4   :  { %457 = vsyncpa [#allocation7], 1 }
 0x3d5   :  { %458 = vsyncpa [#allocation10], 1 }
 0x3d6   :  { %459 = vsyncpa [#allocation5], 1 }

// kernel: tpu_custom_call.1
= control target key start
LH: loop header
LB: loop body
LE: loop exit
PB: predicated region body
PF: predicated region fallthrough
CT: control target
= control target key end

     0   :  { %15 = vsyncpa [#allocation4], 0  ;;  %s887_s0 = inlined_call_operand.hbm [shape: bf16[16,16], index: 0, kind: input, shape index: {}]   ;;  %s888_s1 = inlined_call_operand.hbm [shape: bf16[16,128], index: 1, kind: input, shape index: {}]   ;;  %s889_s2 = inlined_call_operand.vmem [shape: f32[1,128], index: 2, kind: input, shape index: {}]   ;;  %s890_s3 = inlined_call_operand.hbm [shape: bf16[128,128], index: 3, kind: input, shape index: {}]   ;;  %s891_s4 = inlined_call_operand.vmem [shape: f32[1,128], index: 4, kind: input, shape index: {}]   ;;  %s892_s5 = inlined_call_operand.hbm [shape: bf16[128,128], index: 5, kind: input, shape index: {}]   ;;  %s893_s6 = inlined_call_operand.vmem [shape: f32[1,128], index: 6, kind: input, shape index: {}]   ;;  %s894_s7 = inlined_call_operand.vmem [shape: bf16[1,128], index: 7, kind: input, shape index: {}]   ;;  %s895_s8 = inlined_call_operand.<no memory space> [shape: f32[1,1], index: 8, kind: input, shape index: {}]   ;;  %s896_s9 = inlined_call_operand.hbm [shape: f32[1,1,16], index: 9, kind: output, shape index: {}]  }
   0x1   :  { %16 = vsyncpa [#allocation7], 0 }
   0x2   :  { %17 = vsyncpa [#allocation10], 0 }
   0x3   :  { %18 = vsyncpa [#allocation5], 0  ;;  %s701_s30 = smov [#allocation6]   ;;  %s702_s11 = smov [#allocation3]  }
   0x4   :  { %s36_s10 = sshll.u32 %s701_s30, 4  ;;  %s24_s12 = sshll.u32 %s702_s11, 4  ;;  %s37_s10 = int_to_ptr.vmem [resolvable:$true] %s36_s10  ;;  %s760_s12 = int_to_ptr.vmem [resolvable:$true] %s24_s12 }
   0x5   :  { %s583_s15 = scalar_lea.hbm %s888_s1, 128 }
   0x6   :  { %p584_p0 = scmp.ne.s32.totalorder %s888_s1, %s583_s15  ;;  %p587_p1 = scmp.lt.u32.totalorder %s583_s15, %s888_s1 }
   0x8   :  { %p589_p2 = pnand %p587_p1, %p584_p0 }
   0xa   :  { %592 = shalt.err (!%p589_p2)
}
   0xb   :  { %s593_s20 = scalar_lea.vmem %s37_s10, 128  ;;  %p598_p4 = scmp.lt.s32.totalorder %s37_s10, %s37_s10 }
   0xc   :  { %p594_p3 = scmp.ne.s32.totalorder %s37_s10, %s593_s20  ;;  %p599_p5 = scmp.lt.s32.totalorder %s593_s20, %s593_s20 }
   0xe   :  { %p600_p6 = por %p599_p5, %p598_p4 }
  0x10   :  { %p601_p7 = pnand %p600_p6, %p594_p3 }
  0x12   :  { %604 = shalt.err (!%p601_p7)
}
  0x13   :  { %s703_s21 = smov 64   ;;  %s704_s22 = smov 4  }
  0x14   :  { %42 = dma.hbm_to_vmem [thread:$0]  %s888_s1, 128, %s37_s10, [#allocation7], %s703_s21, %s703_s21, %s704_s22  }
  0x15   :  { %s605_s27 = scalar_lea.hbm %s887_s0, 128 }
  0x16   :  { %p606_p8 = scmp.ne.s32.totalorder %s887_s0, %s605_s27  ;;  %p609_p9 = scmp.lt.u32.totalorder %s605_s27, %s887_s0 }
  0x18   :  { %p611_p10 = pnand %p609_p9, %p606_p8 }
  0x1a   :  { %614 = shalt.err (!%p611_p10)
}
  0x1b   :  { %s615_s13 = scalar_lea.vmem %s760_s12, 128  ;;  %p620_p12 = scmp.lt.s32.totalorder %s760_s12, %s760_s12 }
  0x1c   :  { %p616_p11 = scmp.ne.s32.totalorder %s760_s12, %s615_s13  ;;  %p621_p13 = scmp.lt.s32.totalorder %s615_s13, %s615_s13 }
  0x1e   :  { %p622_p0 = por %p621_p13, %p620_p12 }
  0x20   :  { %p623_p1 = pnand %p622_p0, %p616_p11 }
  0x22   :  { %626 = shalt.err (!%p623_p1)
}
  0x23   :  { %30 = dma.hbm_to_vmem [thread:$0]  %s887_s0, 128, %s760_s12, [#allocation4], %s703_s21, %s703_s21, %s704_s22  }
  0x24   :  { %s705_s14 = smov [#allocation8]   ;;  %s706_s16 = smov [#allocation9]  }
  0x25   :  { %s50_s15 = sshll.u32 %s705_s14, 4  ;;  %s64_s17 = sshll.u32 %s706_s16, 4  ;;  %s51_s15 = int_to_ptr.vmem [resolvable:$true] %s50_s15  ;;  %s797_s17 = int_to_ptr.vmem [resolvable:$true] %s64_s17 }
  0x26   :  { %s627_s20 = scalar_lea.hbm %s890_s3, 1024 }
  0x27   :  { %p628_p2 = scmp.ne.s32.totalorder %s890_s3, %s627_s20  ;;  %p631_p3 = scmp.lt.u32.totalorder %s627_s20, %s890_s3 }
  0x29   :  { %p633_p4 = pnand %p631_p3, %p628_p2 }
  0x2b   :  { %636 = shalt.err (!%p633_p4)
}
  0x2c   :  { %s637_s0 = scalar_lea.vmem %s51_s15, 1024  ;;  %p642_p6 = scmp.lt.s32.totalorder %s51_s15, %s51_s15 }
  0x2d   :  { %p638_p5 = scmp.ne.s32.totalorder %s51_s15, %s637_s0  ;;  %p643_p7 = scmp.lt.s32.totalorder %s637_s0, %s637_s0 }
  0x2f   :  { %p644_p8 = por %p643_p7, %p642_p6 }
  0x31   :  { %p645_p9 = pnand %p644_p8, %p638_p5 }
  0x33   :  { %648 = shalt.err (!%p645_p9)
}
  0x34   :  { %56 = dma.hbm_to_vmem [thread:$0]  %s890_s3, 1024, %s51_s15, [#allocation7], %s703_s21, %s703_s21, %s704_s22  }
  0x35   :  { %s649_s30 = scalar_lea.hbm %s892_s5, 1024 }
  0x36   :  { %p650_p10 = scmp.ne.s32.totalorder %s892_s5, %s649_s30  ;;  %p653_p11 = scmp.lt.u32.totalorder %s649_s30, %s892_s5 }
  0x38   :  { %p655_p12 = pnand %p653_p11, %p650_p10 }
  0x3a   :  { %658 = shalt.err (!%p655_p12)
}
  0x3b   :  { %s659_s14 = scalar_lea.vmem %s797_s17, 1024  ;;  %p664_p0 = scmp.lt.s32.totalorder %s797_s17, %s797_s17 }
  0x3c   :  { %p660_p13 = scmp.ne.s32.totalorder %s797_s17, %s659_s14  ;;  %p665_p1 = scmp.lt.s32.totalorder %s659_s14, %s659_s14 }
  0x3e   :  { %p666_p2 = por %p665_p1, %p664_p0 }
  0x40   :  { %p667_p3 = pnand %p666_p2, %p660_p13 }
  0x42   :  { %670 = shalt.err (!%p667_p3)
}
  0x43   :  { %70 = dma.hbm_to_vmem [thread:$0]  %s892_s5, 1024, %s797_s17, [#allocation10], %s703_s21, %s703_s21, %s704_s22  }
  0x44   :  { %693 = dma.done.wait [#allocation4], 128  }
  0x45   :  { %694 = vsyncadd [#allocation4], 4294967168 }
  0x46   :  { %695 = dma.done.wait [#allocation7], 1152  }
  0x47   :  { %696 = vsyncadd [#allocation7], 4294966144 }
  0x48   :  { %697 = dma.done.wait [#allocation10], 1024  }
  0x49   :  { %698 = vsyncadd [#allocation10], 4294966272  ;;  %v707_v0 = vmov 0.0   ;;  %vm708_vm0 = vmmov 0   ;;  %v565_v1 = vld [vmem:[#allocation6] sm:$0xff]   ;;  %v566_v2 = vld [vmem:[#allocation3] sm:$0xff]   ;;  %v400_v58 = vstv %s895_s8 }
  0x4a   :  { %504 = vmatprep.subr.bf16.mxu0 %v707_v0  ;;  %506 = vmatprep.mubr.msk.bf16.mxu0 %vm708_vm0, %v707_v0  ;;  %vm112_vm1 = vcmask 130048   ;;  %v567_v3 = vld [vmem:[#allocation8] sm:$0xff]   ;;  %v568_v4 = vld [vmem:[#allocation8 + $0x8] sm:$0xff]   ;;  %v569_v5 = vld [vmem:[#allocation8 + $0x10] sm:$0xff]   ;;  %s709_s20 = smov [#allocation11]   ;;  %vm441_vm2 = vcmask 122880  }
  0x4b   :  { %510 = vmatprep.subr.bf16.mxu1 %v707_v0  ;;  %526 = vmatprep.mubr.msk.bf16.mxu1 %vm708_vm0, %v707_v0  ;;  %v570_v6 = vld [vmem:[#allocation8 + $0x18] sm:$0xff]   ;;  %v571_v7 = vld [vmem:[#allocation8 + $0x20] sm:$0xff]   ;;  %v572_v8 = vld [vmem:[#allocation8 + $0x28] sm:$0xff]   ;;  %s449_s23 = sshll.u32 %s709_s20, 4  ;;  %s450_s23 = int_to_ptr.vmem [resolvable:$true] %s449_s23 }
  0x4c   :  { %505 = vmatpush3.bf16.msra.mxu0 %v565_v1  ;;  %511 = vmatpush3.bf16.msra.mxu1 %v567_v3  ;;  %v573_v9 = vld [vmem:[#allocation8 + $0x30] sm:$0xff]   ;;  %v574_v10 = vld [vmem:[#allocation8 + $0x38] sm:$0xff]   ;;  %v575_v11 = vld [vmem:[#allocation9] sm:$0xff]   ;;  %s671_s24 = scalar_lea.vmem %s450_s23, 16  ;;  %s675_s25 = scalar_lea.vmem %s450_s23, 32 }
  0x4d   :  { %530 = vmatprep.subr.bf16.mxu0 %v707_v0  ;;  %512 = vmatprep.subr.bf16.mxu1 %v707_v0  ;;  %v576_v12 = vld [vmem:[#allocation9 + $0x8] sm:$0xff]   ;;  %v577_v13 = vld [vmem:[#allocation9 + $0x10] sm:$0xff]   ;;  %v578_v14 = vld [vmem:[#allocation9 + $0x18] sm:$0xff]   ;;  %p672_p4 = scmp.ne.s32.totalorder %s450_s23, %s671_s24  ;;  %p676_p5 = scmp.lt.s32.totalorder %s450_s23, %s450_s23 }
  0x4e   :  { %v579_v15 = vld [vmem:[#allocation9 + $0x20] sm:$0xff]   ;;  %v580_v16 = vld [vmem:[#allocation9 + $0x28] sm:$0xff]   ;;  %v460_v17 = vld [vmem:[%s889_s2] ss:$0 sm:$0xff]  ;;  %p677_p6 = scmp.lt.s32.totalorder %s675_s25, %s671_s24 }
  0x4f   :  { %507 = vmatmul.mubr.msk.bf16.vlgmr.msra.gmra.mrb[0].mxu0 %vm112_vm1, %v566_v2  ;;  %v581_v27 = vld [vmem:[#allocation9 + $0x30] sm:$0xff]   ;;  %v582_v28 = vld [vmem:[#allocation9 + $0x38] sm:$0xff]  }
  0x50   :  { %546 = vmatprep.mubr.msk.bf16.mxu0 %vm708_vm0, %v707_v0  ;;  %513 = vmatpush3.bf16.msra.mxu1 %v568_v4  ;;  %v464_v29 = vld [vmem:[%s891_s4] ss:$0 sm:$0xff]  ;;  %p678_p7 = por %p677_p6, %p676_p5 }
  0x51   :  { %514 = vmatprep.subr.bf16.mxu1 %v707_v0  ;;  %531 = vmatpush3.bf16.msra.mxu0 %v575_v11  ;;  %v473_v39 = vld [vmem:[%s893_s6] ss:$0 sm:$0xff] }
  0x52   :  { %532 = vmatprep.subr.bf16.mxu0 %v707_v0  ;;  %v397_v57 = vld [vmem:[%s894_s7] sm:$0x1]  ;;  %p679_p8 = pnand %p678_p7, %p672_p4 }
  0x54   :  { %515 = vmatpush3.bf16.msra.mxu1 %v569_v5 }
  0x55   :  { %516 = vmatprep.subr.bf16.mxu1 %v707_v0  ;;  %533 = vmatpush3.bf16.msra.mxu0 %v576_v12 }
  0x56   :  { %534 = vmatprep.subr.bf16.mxu0 %v707_v0 }
  0x58   :  { %517 = vmatpush3.bf16.msra.mxu1 %v570_v6 }
  0x59   :  { %518 = vmatprep.subr.bf16.mxu1 %v707_v0  ;;  %535 = vmatpush3.bf16.msra.mxu0 %v577_v13 }
  0x5a   :  { %536 = vmatprep.subr.bf16.mxu0 %v707_v0 }
  0x5c   :  { %519 = vmatpush3.bf16.msra.mxu1 %v571_v7 }
  0x5d   :  { %520 = vmatprep.subr.bf16.mxu1 %v707_v0  ;;  %537 = vmatpush3.bf16.msra.mxu0 %v578_v14 }
  0x5e   :  { %538 = vmatprep.subr.bf16.mxu0 %v707_v0 }
  0x60   :  { %521 = vmatpush3.bf16.msra.mxu1 %v572_v8 }
  0x61   :  { %522 = vmatprep.subr.bf16.mxu1 %v707_v0  ;;  %539 = vmatpush3.bf16.msra.mxu0 %v579_v15 }
  0x62   :  { %540 = vmatprep.subr.bf16.mxu0 %v707_v0 }
  0x64   :  { %523 = vmatpush3.bf16.msra.mxu1 %v573_v9 }
  0x65   :  { %524 = vmatprep.subr.bf16.mxu1 %v707_v0  ;;  %541 = vmatpush3.bf16.msra.mxu0 %v580_v16 }
  0x66   :  { %542 = vmatprep.subr.bf16.mxu0 %v707_v0 }
  0x68   :  { %525 = vmatpush3.bf16.msra.mxu1 %v574_v10 }
  0x69   :  { %550 = vmatprep.subr.bf16.mxu1 %v707_v0  ;;  %543 = vmatpush3.bf16.msra.mxu0 %v581_v27 }
  0x6a   :  { %544 = vmatprep.subr.bf16.mxu0 %v707_v0 }
  0x6d   :  { %545 = vmatpush3.bf16.msra.mxu0 %v582_v28 }
 0x122   :  { %v150_v18 = vpop.f32.mrb[0].mxu0 }
 0x123   :  { %v151_v19 = vadd.f32 %v460_v17, %v150_v18  ;;  %v508_v20 = vpop.f32.mrb[1].mxu0 }
 0x124   :  { %v153_v21 = vpop.f32.mrb[2].mxu0 }
 0x125   :  { %v154_v22 = vadd.f32 %v460_v17, %v153_v21  ;;  %v509_v23 = vpop.f32.mrb[3].mxu0  ;;  %v157_v24 = vmax.f32 %v151_v19, 0.0 }
 0x127   :  { %v158_v25 = vmax.f32 %v154_v22, 0.0 }
 0x129   :  { %v159_v26 = vpack.c.bf16 %v158_v25, %v157_v24 }
 0x12b   :  { %527 = vmatmul.mubr.bf16.vlgmr.msra.gmra.mrb[0].mxu1 %v159_v26 }
 0x12c   :  { %552 = vmatprep.mubr.msk.bf16.mxu1 %vm708_vm0, %v707_v0 }
 0x1fe   :  { %v265_v30 = vpop.f32.mrb[0].mxu1 }
 0x1ff   :  { %v266_v31 = vadd.f32 %v464_v29, %v265_v30  ;;  %v528_v32 = vpop.f32.mrb[1].mxu1 }
 0x200   :  { %v268_v33 = vpop.f32.mrb[2].mxu1 }
 0x201   :  { %v269_v34 = vadd.f32 %v464_v29, %v268_v33  ;;  %v529_v35 = vpop.f32.mrb[3].mxu1  ;;  %v272_v36 = vmax.f32 %v266_v31, 0.0 }
 0x203   :  { %v273_v37 = vmax.f32 %v269_v34, 0.0 }
 0x205   :  { %v274_v38 = vpack.c.bf16 %v273_v37, %v272_v36 }
 0x207   :  { %547 = vmatmul.mubr.bf16.vlgmr.msra.gmra.mrb[4].mxu0 %v274_v38 }
 0x2da   :  { %v380_v40 = vpop.f32.mrb[4].mxu0 }
 0x2db   :  { %v381_v41 = vadd.f32 %v473_v39, %v380_v40  ;;  %v548_v42 = vpop.f32.mrb[5].mxu0 }
 0x2dc   :  { %v383_v43 = vpop.f32.mrb[6].mxu0 }
 0x2dd   :  { %v387_v44 = vadd.f32 3.0, %v381_v41  ;;  %v384_v45 = vadd.f32 %v473_v39, %v383_v43  ;;  %v549_v46 = vpop.f32.mrb[7].mxu0 }
 0x2df   :  { %v389_v47 = vmax.f32 %v387_v44, 0.0  ;;  %v388_v48 = vadd.f32 3.0, %v384_v45 }
 0x2e1   :  { %v391_v49 = vmin.f32 %v389_v47, 6.0  ;;  %v390_v50 = vmax.f32 %v388_v48, 0.0 }
 0x2e3   :  { %v393_v51 = vmul.f32 %v391_v49, %v381_v41  ;;  %v392_v52 = vmin.f32 %v390_v50, 6.0 }
 0x2e5   :  { %v394_v53 = vmul.f32 %v392_v52, %v384_v45  ;;  %v395_v54 = vmul.f32 0.16666667, %v393_v51 }
 0x2e7   :  { %v396_v55 = vmul.f32 0.16666667, %v394_v53 }
 0x2e9   :  { %v398_v56 = vpack.c.bf16 %v396_v55, %v395_v54 }
 0x2eb   :  { %551 = vmatpush3.bf16.xpose.msra.mxu1 %v398_v56 }
 0x2f2   :  { %553 = vmatmul.mubr.bf16.vlgmr.msra.gmra.mrb[4].mxu1 %v397_v57 }
 0x3c5   :  { %v435_v59 = vpop.f32.mrb[4].mxu1 }
 0x3c6   :  { %v436_v60 = vadd.f32 %v435_v59, %v400_v58  ;;  %v554_v61 = vpop.f32.mrb[5].mxu1 }
 0x3c7   :  { %v438_v62 = vpop.f32.mrb[6].mxu1 }
 0x3c8   :  { %v555_v63 = vpop.f32.mrb[7].mxu1  ;;  %442 = vst.msk [vmem:[#allocation11] sm:$0x1] %vm441_vm2, %v436_v60 }
 0x3c9   :  { %682 = shalt.err (!%p679_p8)
}
 0x3ca   :  { %s683_s26 = scalar_lea.hbm %s896_s9, 16 }
 0x3cb   :  { %p684_p9 = scmp.ne.s32.totalorder %s896_s9, %s683_s26  ;;  %p687_p10 = scmp.lt.u32.totalorder %s683_s26, %s896_s9 }
 0x3cd   :  { %p689_p11 = pnand %p687_p10, %p684_p9 }
 0x3cf   :  { %692 = shalt.err (!%p689_p11)
}
 0x3d0   :  { %452 = dma.vmem_to_hbm [thread:$0]  %s450_s23, 16, %s896_s9, [#allocation5]  }
 0x3d1   :  { %699 = dma.done.wait [#allocation5], 16  }
 0x3d2   :  { %700 = vsyncadd [#allocation5], 4294967280 }
 0x3d3   :  { %456 = vsyncpa [#allocation4], 1 }
 0x3d4   :  { %457 = vsyncpa [#allocation7], 1 }
 0x3d5   :  { %458 = vsyncpa [#allocation10], 1 }
 0x3d6   :  { %459 = vsyncpa [#allocation5], 1 }

</bundles_post_ra>
